<compile_context>
chip_gen: v7x
topology: tpu7x:2x2x1
jax: 0.10.0
libtpu: 0.0.40
codegen_flags: <defaults>
</compile_context>

<pallas_src>
import math
import functools

import jax
import jax.numpy as jnp
from jax.experimental import pallas as pl
from jax.experimental.pallas import tpu as pltpu

LN_EPS = 1e-5  # PyTorch LayerNorm default


# ----------------------------- Pallas kernels -----------------------------

def input_proj_pe_kernel(src_ref, w_ref, b_ref, pe_ref, o_ref):
    # y = src @ w_in + b_in + PE[:S]     (one batch sample per grid step)
    x = src_ref[0].astype(jnp.float32)                       # (S, In)
    y = (jnp.dot(x, w_ref[...], preferred_element_type=jnp.float32)
         + b_ref[...] + pe_ref[...])
    o_ref[0] = y.astype(o_ref.dtype)


def _layernorm(x, g, b):
    mu = jnp.mean(x, axis=-1, keepdims=True)
    var = jnp.mean((x - mu) ** 2, axis=-1, keepdims=True)   # biased (PyTorch LN)
    return (x - mu) * jax.lax.rsqrt(var + LN_EPS) * g + b


def encoder_layer_kernel(x_ref, wqkv_ref, bqkv_ref, wo_ref, bo_ref,
                         ln1g_ref, ln1b_ref, w1_ref, b1_ref, w2_ref, b2_ref,
                         ln2g_ref, ln2b_ref, o_ref, *, nhead, scale):
    # One batch sample per grid step.  Post-LN (norm_first=False):
    #   x = LN1(x + SelfAttn(x)) ; x = LN2(x + FFN(x))
    S = x_ref.shape[1]
    D = x_ref.shape[2]
    Dh = D // nhead

    x = x_ref[0].astype(jnp.float32)                          # (S, D)

    # --- fused QKV projection (PyTorch in_proj order: q, k, v) ---
    qkv = (jnp.dot(x, wqkv_ref[...], preferred_element_type=jnp.float32)
           + bqkv_ref[...])                                    # (S, 3D)
    q = qkv[:, 0:D] * scale
    k = qkv[:, D:2 * D]
    v = qkv[:, 2 * D:3 * D]

    # --- multi-head attention; head concat folded into out-projection ---
    attn_out = jnp.zeros((S, D), jnp.float32)
    for h in range(nhead):                                     # static unroll
        sl = slice(h * Dh, (h + 1) * Dh)
        qh, kh, vh = q[:, sl], k[:, sl], v[:, sl]              # (S, Dh)
        s = jnp.dot(qh, kh.T, preferred_element_type=jnp.float32)  # (S, S)
        m = jnp.max(s, axis=-1, keepdims=True)
        p = jnp.exp(s - m)
        p = p * pl.reciprocal(jnp.sum(p, axis=-1, keepdims=True), approx=True)
        oh = jnp.dot(p, vh, preferred_element_type=jnp.float32)     # (S, Dh)
        attn_out = attn_out + jnp.dot(oh, wo_ref[sl, :],
                                      preferred_element_type=jnp.float32)
    attn_out = attn_out + bo_ref[...]

    # --- add & LayerNorm 1 ---
    y = _layernorm(x + attn_out, ln1g_ref[...], ln1b_ref[...])

    # --- FFN: linear1 -> ReLU -> linear2 (dropout = identity) ---
    h1 = (jnp.dot(y, w1_ref[...], preferred_element_type=jnp.float32)
          + b1_ref[...])
    h1 = jnp.maximum(h1, 0.0)
    ff = (jnp.dot(h1, w2_ref[...], preferred_element_type=jnp.float32)
          + b2_ref[...])

    # --- add & LayerNorm 2 ---
    z = _layernorm(y + ff, ln2g_ref[...], ln2b_ref[...])

    o_ref[0] = z.astype(o_ref.dtype)


def heads_kernel(x_ref, w_ref, b_ref, o_ref):
    # merged (server_load | latency | energy) heads: one (D, 3) matmul
    y = (jnp.dot(x_ref[0], w_ref[...], preferred_element_type=jnp.float32)
         + b_ref[...])
    o_ref[0] = y.astype(o_ref.dtype)


# ----------------------------- wrappers -----------------------------

def _full_spec(shape):
    nd = len(shape)
    return pl.BlockSpec(shape, lambda b, _nd=nd: (0,) * _nd)


_PARALLEL_B = pltpu.CompilerParams(dimension_semantics=("parallel",))


def pallas_input_proj_pe(src, w, b, pe):
    B, S, In = src.shape
    D = w.shape[1]
    return pl.pallas_call(
        input_proj_pe_kernel,
        out_shape=jax.ShapeDtypeStruct((B, S, D), jnp.float32),
        grid=(B,),
        in_specs=[
            pl.BlockSpec((1, S, In), lambda b: (b, 0, 0)),
            _full_spec((In, D)),
            _full_spec((1, D)),
            _full_spec((S, D)),
        ],
        out_specs=pl.BlockSpec((1, S, D), lambda b: (b, 0, 0)),
        compiler_params=_PARALLEL_B,
    )(src, w, b.reshape(1, D), pe)


def pallas_encoder_layer(x, p, nhead):
    B, S, D = x.shape
    dff = p['w1'].shape[1]
    scale = 1.0 / math.sqrt(D // nhead)

    x_spec = pl.BlockSpec((1, S, D), lambda b: (b, 0, 0))
    kernel = functools.partial(encoder_layer_kernel, nhead=nhead, scale=scale)

    return pl.pallas_call(
        kernel,
        out_shape=jax.ShapeDtypeStruct((B, S, D), x.dtype),
        grid=(B,),
        in_specs=[
            x_spec,
            _full_spec((D, 3 * D)), _full_spec((1, 3 * D)),   # w_qkv, b_qkv
            _full_spec((D, D)),     _full_spec((1, D)),       # w_o, b_o
            _full_spec((1, D)),     _full_spec((1, D)),       # ln1 g, b
            _full_spec((D, dff)),   _full_spec((1, dff)),     # w1, b1
            _full_spec((dff, D)),   _full_spec((1, D)),       # w2, b2
            _full_spec((1, D)),     _full_spec((1, D)),       # ln2 g, b
        ],
        out_specs=x_spec,
        compiler_params=_PARALLEL_B,
    )(x,
      p['w_qkv'], p['b_qkv'].reshape(1, -1),
      p['w_o'],   p['b_o'].reshape(1, -1),
      p['ln1_g'].reshape(1, -1), p['ln1_b'].reshape(1, -1),
      p['w1'],    p['b1'].reshape(1, -1),
      p['w2'],    p['b2'].reshape(1, -1),
      p['ln2_g'].reshape(1, -1), p['ln2_b'].reshape(1, -1))


def pallas_heads(x, w3, b3):
    B, S, D = x.shape
    N = w3.shape[1]          # 3 merged prediction heads
    return pl.pallas_call(
        heads_kernel,
        out_shape=jax.ShapeDtypeStruct((B, S, N), jnp.float32),
        grid=(B,),
        in_specs=[
            pl.BlockSpec((1, S, D), lambda b: (b, 0, 0)),
            _full_spec((D, N)),
            _full_spec((1, N)),
        ],
        out_specs=pl.BlockSpec((1, S, N), lambda b: (b, 0, 0)),
        compiler_params=_PARALLEL_B,
    )(x, w3, b3)


# ----------------------------- model -----------------------------

def make_positional_encoding(max_len, d_model):
    position = jnp.arange(max_len, dtype=jnp.float32)[:, None]
    div_term = jnp.exp(jnp.arange(0, d_model, 2, dtype=jnp.float32)
                       * (-math.log(10000.0) / d_model))
    pe = jnp.zeros((max_len, d_model), dtype=jnp.float32)
    pe = pe.at[:, 0::2].set(jnp.sin(position * div_term))
    pe = pe.at[:, 1::2].set(jnp.cos(position * div_term))
    return pe


def init_params(key, input_dim, d_model, nhead, num_layers, dff):
    def dense(k, fan_in, fan_out):
        return (0.02 * jax.random.normal(k, (fan_in, fan_out), jnp.float32),
                jnp.zeros((fan_out,), jnp.float32))

    keys = jax.random.split(key, 8 + 4 * num_layers)
    ki = iter(keys)

    params = {}
    params['w_in'], params['b_in'] = dense(next(ki), input_dim, d_model)
    params['pe'] = make_positional_encoding(5000, d_model)

    layers = []
    for _ in range(num_layers):
        lp = {}
        lp['w_qkv'], lp['b_qkv'] = dense(next(ki), d_model, 3 * d_model)
        lp['w_o'],   lp['b_o']   = dense(next(ki), d_model, d_model)
        lp['w1'],    lp['b1']    = dense(next(ki), d_model, dff)
        lp['w2'],    lp['b2']    = dense(next(ki), dff, d_model)
        lp['ln1_g'] = jnp.ones((d_model,), jnp.float32)
        lp['ln1_b'] = jnp.zeros((d_model,), jnp.float32)
        lp['ln2_g'] = jnp.ones((d_model,), jnp.float32)
        lp['ln2_b'] = jnp.zeros((d_model,), jnp.float32)
        layers.append(lp)
    params['layers'] = layers

    params['w_sl'],  params['b_sl']  = dense(next(ki), d_model, 1)
    params['w_lat'], params['b_lat'] = dense(next(ki), d_model, 1)
    params['w_en'],  params['b_en']  = dense(next(ki), d_model, 1)
    return params


def vec_transformer_forward(src, params, *, nhead):
    # src: (B, S, input_dim) float32
    B, S, _ = src.shape
    D = params['w_in'].shape[1]

    # input projection fused with positional-encoding add (PE passed once)
    x = pallas_input_proj_pe(src, params['w_in'], params['b_in'],
                             params['pe'][:S])                    # (B, S, D)

    # fully fused encoder layers (one pallas_call each)
    for lp in params['layers']:
        x = pallas_encoder_layer(x, lp, nhead)

    # merged prediction heads: one (D, 3) matmul, sliced outside
    w_heads = jnp.concatenate(
        [params['w_sl'], params['w_lat'], params['w_en']], axis=1)    # (D, 3)
    b_heads = jnp.concatenate(
        [params['b_sl'], params['b_lat'], params['b_en']]).reshape(1, 3)
    out3 = pallas_heads(x, w_heads, b_heads)                          # (B, S, 3)

    server_load = out3[..., 0:1]
    latency     = out3[..., 1:2]
    energy      = out3[..., 2:3]
    return server_load, latency, energy


# ----------------------------- main -----------------------------

if __name__ == "__main__":
    # small shapes consistent with the module's forward
    B, S, INPUT_DIM = 2, 8, 16
    D_MODEL, NHEAD, NUM_LAYERS, DFF = 32, 4, 2, 64

    key = jax.random.PRNGKey(0)
    k_src, k_par = jax.random.split(key)
    src = jax.random.normal(k_src, (B, S, INPUT_DIM), jnp.float32)
    params = init_params(k_par, INPUT_DIM, D_MODEL, NHEAD, NUM_LAYERS, DFF)

    forward = jax.jit(functools.partial(vec_transformer_forward, nhead=NHEAD))
    server_load, latency, energy = forward(src, params)
    jax.block_until_ready((server_load, latency, energy))

    assert server_load.shape == (B, S, 1)
    assert latency.shape == (B, S, 1)
    assert energy.shape == (B, S, 1)
    print("KERNEL_OK")
</pallas_src>

<mosaic_0001>
module attributes {stable_mosaic.version = 11 : i64} {
  func.func @input_proj_pe_kernel(%arg0: i32, %arg1: memref<1x8x16xf32, #tpu.memory_space<vmem>>, %arg2: memref<16x32xf32, #tpu.memory_space<vmem>>, %arg3: memref<1x32xf32, #tpu.memory_space<vmem>>, %arg4: memref<8x32xf32, #tpu.memory_space<vmem>>, %arg5: memref<1x8x32xf32, #tpu.memory_space<vmem>>) attributes {dimension_semantics = [#tpu.dimension_semantics<parallel>], iteration_bounds = array<i64: 2>, scalar_prefetch = 0 : i64, scratch_operands = 0 : i64, tpu.core_type = #tpu.core_type<tc>, window_params = [{transform_indices = @transform_0, window_bounds = array<i64: 1, 8, 16>}, {pipeline_mode = #tpu.pipeline_mode<synchronous>, transform_indices = @transform_1, window_bounds = array<i64: 16, 32>}, {pipeline_mode = #tpu.pipeline_mode<synchronous>, transform_indices = @transform_2, window_bounds = array<i64: 1, 32>}, {pipeline_mode = #tpu.pipeline_mode<synchronous>, transform_indices = @transform_3, window_bounds = array<i64: 8, 32>}, {transform_indices = @transform_4, window_bounds = array<i64: 1, 8, 32>}]} {
    %c0 = arith.constant 0 : index
    %c0_0 = arith.constant 0 : index
    %c0_1 = arith.constant 0 : index
    %0 = vector.load %arg1[%c0, %c0_0, %c0_1] : memref<1x8x16xf32, #tpu.memory_space<vmem>>, vector<1x8x16xf32>
    %1 = vector.shape_cast %0 : vector<1x8x16xf32> to vector<8x16xf32>
    %c0_2 = arith.constant 0 : index
    %c0_3 = arith.constant 0 : index
    %2 = vector.load %arg2[%c0_2, %c0_3] : memref<16x32xf32, #tpu.memory_space<vmem>>, vector<16x32xf32>
    %cst = arith.constant dense<0.000000e+00> : vector<8x32xf32>
    %3 = tpu.matmul %1, %2, %cst {dimension_numbers = #tpu.dot_dimension_numbers<[1], [0], [0], [1], [0, 0, 1, 1], [], []>} : vector<8x16xf32>, vector<16x32xf32>, vector<8x32xf32> -> vector<8x32xf32>
    %c0_4 = arith.constant 0 : index
    %c0_5 = arith.constant 0 : index
    %4 = vector.load %arg3[%c0_4, %c0_5] : memref<1x32xf32, #tpu.memory_space<vmem>>, vector<1x32xf32>
    %5 = vector.broadcast %4 : vector<1x32xf32> to vector<8x32xf32>
    %6 = arith.addf %3, %5 : vector<8x32xf32>
    %c0_6 = arith.constant 0 : index
    %c0_7 = arith.constant 0 : index
    %7 = vector.load %arg4[%c0_6, %c0_7] : memref<8x32xf32, #tpu.memory_space<vmem>>, vector<8x32xf32>
    %8 = arith.addf %6, %7 : vector<8x32xf32>
    %c0_8 = arith.constant 0 : index
    %c0_9 = arith.constant 0 : index
    %c0_10 = arith.constant 0 : index
    %9 = vector.load %arg5[%c0_8, %c0_9, %c0_10] : memref<1x8x32xf32, #tpu.memory_space<vmem>>, vector<1x8x32xf32>
    %10 = vector.shape_cast %9 : vector<1x8x32xf32> to vector<8x32xf32>
    %11 = vector.shape_cast %8 : vector<8x32xf32> to vector<1x8x32xf32>
    tpu.vector_store %arg5[%c0_8, %c0_9, %c0_10], %11 {strides = array<i32>} : memref<1x8x32xf32, #tpu.memory_space<vmem>>, vector<1x8x32xf32>,
    return
  }
  func.func @transform_0(%arg0: i32) -> (i32, i32, i32) {
    %c0_i32 = arith.constant 0 : i32
    %c0_i32_0 = arith.constant 0 : i32
    %c0_i32_1 = arith.constant 0 : i32
    return %arg0, %c0_i32, %c0_i32_0 : i32, i32, i32
  }
  func.func @transform_1(%arg0: i32) -> (i32, i32) {
    %c0_i32 = arith.constant 0 : i32
    %c0_i32_0 = arith.constant 0 : i32
    %c0_i32_1 = arith.constant 0 : i32
    return %c0_i32, %c0_i32_0 : i32, i32
  }
  func.func @transform_2(%arg0: i32) -> (i32, i32) {
    %c0_i32 = arith.constant 0 : i32
    %c0_i32_0 = arith.constant 0 : i32
    %c0_i32_1 = arith.constant 0 : i32
    return %c0_i32, %c0_i32_0 : i32, i32
  }
  func.func @transform_3(%arg0: i32) -> (i32, i32) {
    %c0_i32 = arith.constant 0 : i32
    %c0_i32_0 = arith.constant 0 : i32
    %c0_i32_1 = arith.constant 0 : i32
    return %c0_i32, %c0_i32_0 : i32, i32
  }
  func.func @transform_4(%arg0: i32) -> (i32, i32, i32) {
    %c0_i32 = arith.constant 0 : i32
    %c0_i32_0 = arith.constant 0 : i32
    %c0_i32_1 = arith.constant 0 : i32
    return %arg0, %c0_i32, %c0_i32_0 : i32, i32, i32
  }
}

module attributes {stable_mosaic.version = 11 : i64} {
  func.func @encoder_layer_kernel(%arg0: i32, %arg1: memref<1x8x32xf32, #tpu.memory_space<vmem>>, %arg2: memref<32x96xf32, #tpu.memory_space<vmem>>, %arg3: memref<1x96xf32, #tpu.memory_space<vmem>>, %arg4: memref<32x32xf32, #tpu.memory_space<vmem>>, %arg5: memref<1x32xf32, #tpu.memory_space<vmem>>, %arg6: memref<1x32xf32, #tpu.memory_space<vmem>>, %arg7: memref<1x32xf32, #tpu.memory_space<vmem>>, %arg8: memref<32x64xf32, #tpu.memory_space<vmem>>, %arg9: memref<1x64xf32, #tpu.memory_space<vmem>>, %arg10: memref<64x32xf32, #tpu.memory_space<vmem>>, %arg11: memref<1x32xf32, #tpu.memory_space<vmem>>, %arg12: memref<1x32xf32, #tpu.memory_space<vmem>>, %arg13: memref<1x32xf32, #tpu.memory_space<vmem>>, %arg14: memref<1x8x32xf32, #tpu.memory_space<vmem>>) attributes {dimension_semantics = [#tpu.dimension_semantics<parallel>], iteration_bounds = array<i64: 2>, scalar_prefetch = 0 : i64, scratch_operands = 0 : i64, tpu.core_type = #tpu.core_type<tc>, window_params = [{transform_indices = @transform_0, window_bounds = array<i64: 1, 8, 32>}, {pipeline_mode = #tpu.pipeline_mode<synchronous>, transform_indices = @transform_1, window_bounds = array<i64: 32, 96>}, {pipeline_mode = #tpu.pipeline_mode<synchronous>, transform_indices = @transform_2, window_bounds = array<i64: 1, 96>}, {pipeline_mode = #tpu.pipeline_mode<synchronous>, transform_indices = @transform_3, window_bounds = array<i64: 32, 32>}, {pipeline_mode = #tpu.pipeline_mode<synchronous>, transform_indices = @transform_4, window_bounds = array<i64: 1, 32>}, {pipeline_mode = #tpu.pipeline_mode<synchronous>, transform_indices = @transform_5, window_bounds = array<i64: 1, 32>}, {pipeline_mode = #tpu.pipeline_mode<synchronous>, transform_indices = @transform_6, window_bounds = array<i64: 1, 32>}, {pipeline_mode = #tpu.pipeline_mode<synchronous>, transform_indices = @transform_7, window_bounds = array<i64: 32, 64>}, {pipeline_mode = #tpu.pipeline_mode<synchronous>, transform_indices = @transform_8, window_bounds = array<i64: 1, 64>}, {pipeline_mode = #tpu.pipeline_mode<synchronous>, transform_indices = @transform_9, window_bounds = array<i64: 64, 32>}, {pipeline_mode = #tpu.pipeline_mode<synchronous>, transform_indices = @transform_10, window_bounds = array<i64: 1, 32>}, {pipeline_mode = #tpu.pipeline_mode<synchronous>, transform_indices = @transform_11, window_bounds = array<i64: 1, 32>}, {pipeline_mode = #tpu.pipeline_mode<synchronous>, transform_indices = @transform_12, window_bounds = array<i64: 1, 32>}, {transform_indices = @transform_13, window_bounds = array<i64: 1, 8, 32>}]} {
    %c0 = arith.constant 0 : index
    %c0_0 = arith.constant 0 : index
    %c0_1 = arith.constant 0 : index
    %0 = vector.load %arg1[%c0, %c0_0, %c0_1] : memref<1x8x32xf32, #tpu.memory_space<vmem>>, vector<1x8x32xf32>
    %1 = vector.shape_cast %0 : vector<1x8x32xf32> to vector<8x32xf32>
    %c0_2 = arith.constant 0 : index
    %c0_3 = arith.constant 0 : index
    %2 = vector.load %arg2[%c0_2, %c0_3] : memref<32x96xf32, #tpu.memory_space<vmem>>, vector<32x96xf32>
    %cst = arith.constant dense<0.000000e+00> : vector<8x96xf32>
    %3 = tpu.matmul %1, %2, %cst {dimension_numbers = #tpu.dot_dimension_numbers<[1], [0], [0], [1], [0, 0, 1, 1], [], []>} : vector<8x32xf32>, vector<32x96xf32>, vector<8x96xf32> -> vector<8x96xf32>
    %c0_4 = arith.constant 0 : index
    %c0_5 = arith.constant 0 : index
    %4 = vector.load %arg3[%c0_4, %c0_5] : memref<1x96xf32, #tpu.memory_space<vmem>>, vector<1x96xf32>
    %5 = vector.broadcast %4 : vector<1x96xf32> to vector<8x96xf32>
    %6 = arith.addf %3, %5 : vector<8x96xf32>
    %7 = vector.extract_strided_slice %6 {offsets = [0, 0], sizes = [8, 32], strides = [1, 1]} : vector<8x96xf32> to vector<8x32xf32>
    %cst_6 = arith.constant 0.353553385 : f32
    %8 = vector.broadcast %cst_6 : f32 to vector<8x32xf32>
    %9 = arith.mulf %7, %8 : vector<8x32xf32>
    %10 = vector.extract_strided_slice %6 {offsets = [0, 32], sizes = [8, 32], strides = [1, 1]} : vector<8x96xf32> to vector<8x32xf32>
    %11 = vector.extract_strided_slice %6 {offsets = [0, 64], sizes = [8, 32], strides = [1, 1]} : vector<8x96xf32> to vector<8x32xf32>
    %cst_7 = arith.constant 0.000000e+00 : f32
    %12 = vector.broadcast %cst_7 : f32 to vector<8x32xf32>
    %13 = vector.extract_strided_slice %9 {offsets = [0, 0], sizes = [8, 8], strides = [1, 1]} : vector<8x32xf32> to vector<8x8xf32>
    %14 = vector.extract_strided_slice %10 {offsets = [0, 0], sizes = [8, 8], strides = [1, 1]} : vector<8x32xf32> to vector<8x8xf32>
    %15 = vector.extract_strided_slice %11 {offsets = [0, 0], sizes = [8, 8], strides = [1, 1]} : vector<8x32xf32> to vector<8x8xf32>
    %16 = tpu.transpose %14, [1, 0] : vector<8x8xf32> -> vector<8x8xf32>
    %cst_8 = arith.constant dense<0.000000e+00> : vector<8x8xf32>
    %17 = tpu.matmul %13, %16, %cst_8 {dimension_numbers = #tpu.dot_dimension_numbers<[1], [0], [0], [1], [0, 0, 1, 1], [], []>} : vector<8x8xf32>, vector<8x8xf32>, vector<8x8xf32> -> vector<8x8xf32>
    %cst_9 = arith.constant dense<0xFF800000> : vector<8xf32>
    %18 = vector.multi_reduction <maximumf>, %17, %cst_9 [1] : vector<8x8xf32> to vector<8xf32>
    %19 = vector.shape_cast %18 : vector<8xf32> to vector<8x1xf32>
    %20 = vector.broadcast %19 : vector<8x1xf32> to vector<8x8xf32>
    %21 = arith.subf %17, %20 : vector<8x8xf32>
    %22 = math.exp %21 : vector<8x8xf32>
    %cst_10 = arith.constant dense<0.000000e+00> : vector<8xf32>
    %23 = vector.multi_reduction <add>, %22, %cst_10 [1] : vector<8x8xf32> to vector<8xf32>
    %24 = vector.shape_cast %23 : vector<8xf32> to vector<8x1xf32>
    %25 = tpu.reciprocal %24 {approx = true} : vector<8x1xf32> -> vector<8x1xf32>
    %26 = vector.broadcast %25 : vector<8x1xf32> to vector<8x8xf32>
    %27 = arith.mulf %22, %26 : vector<8x8xf32>
    %cst_11 = arith.constant dense<0.000000e+00> : vector<8x8xf32>
    %28 = tpu.matmul %27, %15, %cst_11 {dimension_numbers = #tpu.dot_dimension_numbers<[1], [0], [0], [1], [0, 0, 1, 1], [], []>} : vector<8x8xf32>, vector<8x8xf32>, vector<8x8xf32> -> vector<8x8xf32>
    %c0_12 = arith.constant 0 : index
    %c0_13 = arith.constant 0 : index
    %29 = vector.load %arg4[%c0_12, %c0_13] : memref<32x32xf32, #tpu.memory_space<vmem>>, vector<8x32xf32>
    %cst_14 = arith.constant dense<0.000000e+00> : vector<8x32xf32>
    %30 = tpu.matmul %28, %29, %cst_14 {dimension_numbers = #tpu.dot_dimension_numbers<[1], [0], [0], [1], [0, 0, 1, 1], [], []>} : vector<8x8xf32>, vector<8x32xf32>, vector<8x32xf32> -> vector<8x32xf32>
    %31 = arith.addf %12, %30 : vector<8x32xf32>
    %32 = vector.extract_strided_slice %9 {offsets = [0, 8], sizes = [8, 8], strides = [1, 1]} : vector<8x32xf32> to vector<8x8xf32>
    %33 = vector.extract_strided_slice %10 {offsets = [0, 8], sizes = [8, 8], strides = [1, 1]} : vector<8x32xf32> to vector<8x8xf32>
    %34 = vector.extract_strided_slice %11 {offsets = [0, 8], sizes = [8, 8], strides = [1, 1]} : vector<8x32xf32> to vector<8x8xf32>
    %35 = tpu.transpose %33, [1, 0] : vector<8x8xf32> -> vector<8x8xf32>
    %cst_15 = arith.constant dense<0.000000e+00> : vector<8x8xf32>
    %36 = tpu.matmul %32, %35, %cst_15 {dimension_numbers = #tpu.dot_dimension_numbers<[1], [0], [0], [1], [0, 0, 1, 1], [], []>} : vector<8x8xf32>, vector<8x8xf32>, vector<8x8xf32> -> vector<8x8xf32>
    %cst_16 = arith.constant dense<0xFF800000> : vector<8xf32>
    %37 = vector.multi_reduction <maximumf>, %36, %cst_16 [1] : vector<8x8xf32> to vector<8xf32>
    %38 = vector.shape_cast %37 : vector<8xf32> to vector<8x1xf32>
    %39 = vector.broadcast %38 : vector<8x1xf32> to vector<8x8xf32>
    %40 = arith.subf %36, %39 : vector<8x8xf32>
    %41 = math.exp %40 : vector<8x8xf32>
    %cst_17 = arith.constant dense<0.000000e+00> : vector<8xf32>
    %42 = vector.multi_reduction <add>, %41, %cst_17 [1] : vector<8x8xf32> to vector<8xf32>
    %43 = vector.shape_cast %42 : vector<8xf32> to vector<8x1xf32>
    %44 = tpu.reciprocal %43 {approx = true} : vector<8x1xf32> -> vector<8x1xf32>
    %45 = vector.broadcast %44 : vector<8x1xf32> to vector<8x8xf32>
    %46 = arith.mulf %41, %45 : vector<8x8xf32>
    %cst_18 = arith.constant dense<0.000000e+00> : vector<8x8xf32>
    %47 = tpu.matmul %46, %34, %cst_18 {dimension_numbers = #tpu.dot_dimension_numbers<[1], [0], [0], [1], [0, 0, 1, 1], [], []>} : vector<8x8xf32>, vector<8x8xf32>, vector<8x8xf32> -> vector<8x8xf32>
    %c8 = arith.constant 8 : index
    %c0_19 = arith.constant 0 : index
    %48 = vector.load %arg4[%c8, %c0_19] : memref<32x32xf32, #tpu.memory_space<vmem>>, vector<8x32xf32>
    %cst_20 = arith.constant dense<0.000000e+00> : vector<8x32xf32>
    %49 = tpu.matmul %47, %48, %cst_20 {dimension_numbers = #tpu.dot_dimension_numbers<[1], [0], [0], [1], [0, 0, 1, 1], [], []>} : vector<8x8xf32>, vector<8x32xf32>, vector<8x32xf32> -> vector<8x32xf32>
    %50 = arith.addf %31, %49 : vector<8x32xf32>
    %51 = vector.extract_strided_slice %9 {offsets = [0, 16], sizes = [8, 8], strides = [1, 1]} : vector<8x32xf32> to vector<8x8xf32>
    %52 = vector.extract_strided_slice %10 {offsets = [0, 16], sizes = [8, 8], strides = [1, 1]} : vector<8x32xf32> to vector<8x8xf32>
    %53 = vector.extract_strided_slice %11 {offsets = [0, 16], sizes = [8, 8], strides = [1, 1]} : vector<8x32xf32> to vector<8x8xf32>
    %54 = tpu.transpose %52, [1, 0] : vector<8x8xf32> -> vector<8x8xf32>
    %cst_21 = arith.constant dense<0.000000e+00> : vector<8x8xf32>
    %55 = tpu.matmul %51, %54, %cst_21 {dimension_numbers = #tpu.dot_dimension_numbers<[1], [0], [0], [1], [0, 0, 1, 1], [], []>} : vector<8x8xf32>, vector<8x8xf32>, vector<8x8xf32> -> vector<8x8xf32>
    %cst_22 = arith.constant dense<0xFF800000> : vector<8xf32>
    %56 = vector.multi_reduction <maximumf>, %55, %cst_22 [1] : vector<8x8xf32> to vector<8xf32>
    %57 = vector.shape_cast %56 : vector<8xf32> to vector<8x1xf32>
    %58 = vector.broadcast %57 : vector<8x1xf32> to vector<8x8xf32>
    %59 = arith.subf %55, %58 : vector<8x8xf32>
    %60 = math.exp %59 : vector<8x8xf32>
    %cst_23 = arith.constant dense<0.000000e+00> : vector<8xf32>
    %61 = vector.multi_reduction <add>, %60, %cst_23 [1] : vector<8x8xf32> to vector<8xf32>
    %62 = vector.shape_cast %61 : vector<8xf32> to vector<8x1xf32>
    %63 = tpu.reciprocal %62 {approx = true} : vector<8x1xf32> -> vector<8x1xf32>
    %64 = vector.broadcast %63 : vector<8x1xf32> to vector<8x8xf32>
    %65 = arith.mulf %60, %64 : vector<8x8xf32>
    %cst_24 = arith.constant dense<0.000000e+00> : vector<8x8xf32>
    %66 = tpu.matmul %65, %53, %cst_24 {dimension_numbers = #tpu.dot_dimension_numbers<[1], [0], [0], [1], [0, 0, 1, 1], [], []>} : vector<8x8xf32>, vector<8x8xf32>, vector<8x8xf32> -> vector<8x8xf32>
    %c16 = arith.constant 16 : index
    %c0_25 = arith.constant 0 : index
    %67 = vector.load %arg4[%c16, %c0_25] : memref<32x32xf32, #tpu.memory_space<vmem>>, vector<8x32xf32>
    %cst_26 = arith.constant dense<0.000000e+00> : vector<8x32xf32>
    %68 = tpu.matmul %66, %67, %cst_26 {dimension_numbers = #tpu.dot_dimension_numbers<[1], [0], [0], [1], [0, 0, 1, 1], [], []>} : vector<8x8xf32>, vector<8x32xf32>, vector<8x32xf32> -> vector<8x32xf32>
    %69 = arith.addf %50, %68 : vector<8x32xf32>
    %70 = vector.extract_strided_slice %9 {offsets = [0, 24], sizes = [8, 8], strides = [1, 1]} : vector<8x32xf32> to vector<8x8xf32>
    %71 = vector.extract_strided_slice %10 {offsets = [0, 24], sizes = [8, 8], strides = [1, 1]} : vector<8x32xf32> to vector<8x8xf32>
    %72 = vector.extract_strided_slice %11 {offsets = [0, 24], sizes = [8, 8], strides = [1, 1]} : vector<8x32xf32> to vector<8x8xf32>
    %73 = tpu.transpose %71, [1, 0] : vector<8x8xf32> -> vector<8x8xf32>
    %cst_27 = arith.constant dense<0.000000e+00> : vector<8x8xf32>
    %74 = tpu.matmul %70, %73, %cst_27 {dimension_numbers = #tpu.dot_dimension_numbers<[1], [0], [0], [1], [0, 0, 1, 1], [], []>} : vector<8x8xf32>, vector<8x8xf32>, vector<8x8xf32> -> vector<8x8xf32>
    %cst_28 = arith.constant dense<0xFF800000> : vector<8xf32>
    %75 = vector.multi_reduction <maximumf>, %74, %cst_28 [1] : vector<8x8xf32> to vector<8xf32>
    %76 = vector.shape_cast %75 : vector<8xf32> to vector<8x1xf32>
    %77 = vector.broadcast %76 : vector<8x1xf32> to vector<8x8xf32>
    %78 = arith.subf %74, %77 : vector<8x8xf32>
    %79 = math.exp %78 : vector<8x8xf32>
    %cst_29 = arith.constant dense<0.000000e+00> : vector<8xf32>
    %80 = vector.multi_reduction <add>, %79, %cst_29 [1] : vector<8x8xf32> to vector<8xf32>
    %81 = vector.shape_cast %80 : vector<8xf32> to vector<8x1xf32>
    %82 = tpu.reciprocal %81 {approx = true} : vector<8x1xf32> -> vector<8x1xf32>
    %83 = vector.broadcast %82 : vector<8x1xf32> to vector<8x8xf32>
    %84 = arith.mulf %79, %83 : vector<8x8xf32>
    %cst_30 = arith.constant dense<0.000000e+00> : vector<8x8xf32>
    %85 = tpu.matmul %84, %72, %cst_30 {dimension_numbers = #tpu.dot_dimension_numbers<[1], [0], [0], [1], [0, 0, 1, 1], [], []>} : vector<8x8xf32>, vector<8x8xf32>, vector<8x8xf32> -> vector<8x8xf32>
    %c24 = arith.constant 24 : index
    %c0_31 = arith.constant 0 : index
    %86 = vector.load %arg4[%c24, %c0_31] : memref<32x32xf32, #tpu.memory_space<vmem>>, vector<8x32xf32>
    %cst_32 = arith.constant dense<0.000000e+00> : vector<8x32xf32>
    %87 = tpu.matmul %85, %86, %cst_32 {dimension_numbers = #tpu.dot_dimension_numbers<[1], [0], [0], [1], [0, 0, 1, 1], [], []>} : vector<8x8xf32>, vector<8x32xf32>, vector<8x32xf32> -> vector<8x32xf32>
    %88 = arith.addf %69, %87 : vector<8x32xf32>
    %c0_33 = arith.constant 0 : index
    %c0_34 = arith.constant 0 : index
    %89 = vector.load %arg5[%c0_33, %c0_34] : memref<1x32xf32, #tpu.memory_space<vmem>>, vector<1x32xf32>
    %90 = vector.broadcast %89 : vector<1x32xf32> to vector<8x32xf32>
    %91 = arith.addf %88, %90 : vector<8x32xf32>
    %92 = arith.addf %1, %91 : vector<8x32xf32>
    %c0_35 = arith.constant 0 : index
    %c0_36 = arith.constant 0 : index
    %93 = vector.load %arg6[%c0_35, %c0_36] : memref<1x32xf32, #tpu.memory_space<vmem>>, vector<1x32xf32>
    %c0_37 = arith.constant 0 : index
    %c0_38 = arith.constant 0 : index
    %94 = vector.load %arg7[%c0_37, %c0_38] : memref<1x32xf32, #tpu.memory_space<vmem>>, vector<1x32xf32>
    %cst_39 = arith.constant dense<0.000000e+00> : vector<8xf32>
    %95 = vector.multi_reduction <add>, %92, %cst_39 [1] : vector<8x32xf32> to vector<8xf32>
    %96 = vector.shape_cast %95 : vector<8xf32> to vector<8x1xf32>
    %cst_40 = arith.constant 3.200000e+01 : f32
    %97 = vector.broadcast %cst_40 : f32 to vector<8x1xf32>
    %98 = arith.divf %96, %97 : vector<8x1xf32>
    %99 = vector.broadcast %98 : vector<8x1xf32> to vector<8x32xf32>
    %100 = arith.subf %92, %99 : vector<8x32xf32>
    %101 = arith.mulf %100, %100 : vector<8x32xf32>
    %cst_41 = arith.constant dense<0.000000e+00> : vector<8xf32>
    %102 = vector.multi_reduction <add>, %101, %cst_41 [1] : vector<8x32xf32> to vector<8xf32>
    %103 = vector.shape_cast %102 : vector<8xf32> to vector<8x1xf32>
    %cst_42 = arith.constant 3.200000e+01 : f32
    %104 = vector.broadcast %cst_42 : f32 to vector<8x1xf32>
    %105 = arith.divf %103, %104 : vector<8x1xf32>
    %106 = vector.broadcast %98 : vector<8x1xf32> to vector<8x32xf32>
    %107 = arith.subf %92, %106 : vector<8x32xf32>
    %cst_43 = arith.constant 9.99999974E-6 : f32
    %108 = vector.broadcast %cst_43 : f32 to vector<8x1xf32>
    %109 = arith.addf %105, %108 : vector<8x1xf32>
    %110 = math.rsqrt %109 : vector<8x1xf32>
    %111 = vector.broadcast %110 : vector<8x1xf32> to vector<8x32xf32>
    %112 = arith.mulf %107, %111 : vector<8x32xf32>
    %113 = vector.broadcast %93 : vector<1x32xf32> to vector<8x32xf32>
    %114 = arith.mulf %112, %113 : vector<8x32xf32>
    %115 = vector.broadcast %94 : vector<1x32xf32> to vector<8x32xf32>
    %116 = arith.addf %114, %115 : vector<8x32xf32>
    %c0_44 = arith.constant 0 : index
    %c0_45 = arith.constant 0 : index
    %117 = vector.load %arg8[%c0_44, %c0_45] : memref<32x64xf32, #tpu.memory_space<vmem>>, vector<32x64xf32>
    %cst_46 = arith.constant dense<0.000000e+00> : vector<8x64xf32>
    %118 = tpu.matmul %116, %117, %cst_46 {dimension_numbers = #tpu.dot_dimension_numbers<[1], [0], [0], [1], [0, 0, 1, 1], [], []>} : vector<8x32xf32>, vector<32x64xf32>, vector<8x64xf32> -> vector<8x64xf32>
    %c0_47 = arith.constant 0 : index
    %c0_48 = arith.constant 0 : index
    %119 = vector.load %arg9[%c0_47, %c0_48] : memref<1x64xf32, #tpu.memory_space<vmem>>, vector<1x64xf32>
    %120 = vector.broadcast %119 : vector<1x64xf32> to vector<8x64xf32>
    %121 = arith.addf %118, %120 : vector<8x64xf32>
    %cst_49 = arith.constant 0.000000e+00 : f32
    %122 = vector.broadcast %cst_49 : f32 to vector<8x64xf32>
    %123 = arith.maximumf %121, %122 : vector<8x64xf32>
    %c0_50 = arith.constant 0 : index
    %c0_51 = arith.constant 0 : index
    %124 = vector.load %arg10[%c0_50, %c0_51] : memref<64x32xf32, #tpu.memory_space<vmem>>, vector<64x32xf32>
    %cst_52 = arith.constant dense<0.000000e+00> : vector<8x32xf32>
    %125 = tpu.matmul %123, %124, %cst_52 {dimension_numbers = #tpu.dot_dimension_numbers<[1], [0], [0], [1], [0, 0, 1, 1], [], []>} : vector<8x64xf32>, vector<64x32xf32>, vector<8x32xf32> -> vector<8x32xf32>
    %c0_53 = arith.constant 0 : index
    %c0_54 = arith.constant 0 : index
    %126 = vector.load %arg11[%c0_53, %c0_54] : memref<1x32xf32, #tpu.memory_space<vmem>>, vector<1x32xf32>
    %127 = vector.broadcast %126 : vector<1x32xf32> to vector<8x32xf32>
    %128 = arith.addf %125, %127 : vector<8x32xf32>
    %129 = arith.addf %116, %128 : vector<8x32xf32>
    %c0_55 = arith.constant 0 : index
    %c0_56 = arith.constant 0 : index
    %130 = vector.load %arg12[%c0_55, %c0_56] : memref<1x32xf32, #tpu.memory_space<vmem>>, vector<1x32xf32>
    %c0_57 = arith.constant 0 : index
    %c0_58 = arith.constant 0 : index
    %131 = vector.load %arg13[%c0_57, %c0_58] : memref<1x32xf32, #tpu.memory_space<vmem>>, vector<1x32xf32>
    %cst_59 = arith.constant dense<0.000000e+00> : vector<8xf32>
    %132 = vector.multi_reduction <add>, %129, %cst_59 [1] : vector<8x32xf32> to vector<8xf32>
    %133 = vector.shape_cast %132 : vector<8xf32> to vector<8x1xf32>
    %cst_60 = arith.constant 3.200000e+01 : f32
    %134 = vector.broadcast %cst_60 : f32 to vector<8x1xf32>
    %135 = arith.divf %133, %134 : vector<8x1xf32>
    %136 = vector.broadcast %135 : vector<8x1xf32> to vector<8x32xf32>
    %137 = arith.subf %129, %136 : vector<8x32xf32>
    %138 = arith.mulf %137, %137 : vector<8x32xf32>
    %cst_61 = arith.constant dense<0.000000e+00> : vector<8xf32>
    %139 = vector.multi_reduction <add>, %138, %cst_61 [1] : vector<8x32xf32> to vector<8xf32>
    %140 = vector.shape_cast %139 : vector<8xf32> to vector<8x1xf32>
    %cst_62 = arith.constant 3.200000e+01 : f32
    %141 = vector.broadcast %cst_62 : f32 to vector<8x1xf32>
    %142 = arith.divf %140, %141 : vector<8x1xf32>
    %143 = vector.broadcast %135 : vector<8x1xf32> to vector<8x32xf32>
    %144 = arith.subf %129, %143 : vector<8x32xf32>
    %cst_63 = arith.constant 9.99999974E-6 : f32
    %145 = vector.broadcast %cst_63 : f32 to vector<8x1xf32>
    %146 = arith.addf %142, %145 : vector<8x1xf32>
    %147 = math.rsqrt %146 : vector<8x1xf32>
    %148 = vector.broadcast %147 : vector<8x1xf32> to vector<8x32xf32>
    %149 = arith.mulf %144, %148 : vector<8x32xf32>
    %150 = vector.broadcast %130 : vector<1x32xf32> to vector<8x32xf32>
    %151 = arith.mulf %149, %150 : vector<8x32xf32>
    %152 = vector.broadcast %131 : vector<1x32xf32> to vector<8x32xf32>
    %153 = arith.addf %151, %152 : vector<8x32xf32>
    %c0_64 = arith.constant 0 : index
    %c0_65 = arith.constant 0 : index
    %c0_66 = arith.constant 0 : index
    %154 = vector.load %arg14[%c0_64, %c0_65, %c0_66] : memref<1x8x32xf32, #tpu.memory_space<vmem>>, vector<1x8x32xf32>
    %155 = vector.shape_cast %154 : vector<1x8x32xf32> to vector<8x32xf32>
    %156 = vector.shape_cast %153 : vector<8x32xf32> to vector<1x8x32xf32>
    tpu.vector_store %arg14[%c0_64, %c0_65, %c0_66], %156 {strides = array<i32>} : memref<1x8x32xf32, #tpu.memory_space<vmem>>, vector<1x8x32xf32>,
    return
  }
  func.func @transform_0(%arg0: i32) -> (i32, i32, i32) {
    %c0_i32 = arith.constant 0 : i32
    %c0_i32_0 = arith.constant 0 : i32
    %c0_i32_1 = arith.constant 0 : i32
    return %arg0, %c0_i32, %c0_i32_0 : i32, i32, i32
  }
  func.func @transform_1(%arg0: i32) -> (i32, i32) {
    %c0_i32 = arith.constant 0 : i32
    %c0_i32_0 = arith.constant 0 : i32
    %c0_i32_1 = arith.constant 0 : i32
    return %c0_i32, %c0_i32_0 : i32, i32
  }
  func.func @transform_2(%arg0: i32) -> (i32, i32) {
    %c0_i32 = arith.constant 0 : i32
    %c0_i32_0 = arith.constant 0 : i32
    %c0_i32_1 = arith.constant 0 : i32
    return %c0_i32, %c0_i32_0 : i32, i32
  }
  func.func @transform_3(%arg0: i32) -> (i32, i32) {
    %c0_i32 = arith.constant 0 : i32
    %c0_i32_0 = arith.constant 0 : i32
    %c0_i32_1 = arith.constant 0 : i32
    return %c0_i32, %c0_i32_0 : i32, i32
  }
  func.func @transform_4(%arg0: i32) -> (i32, i32) {
    %c0_i32 = arith.constant 0 : i32
    %c0_i32_0 = arith.constant 0 : i32
    %c0_i32_1 = arith.constant 0 : i32
    return %c0_i32, %c0_i32_0 : i32, i32
  }
  func.func @transform_5(%arg0: i32) -> (i32, i32) {
    %c0_i32 = arith.constant 0 : i32
    %c0_i32_0 = arith.constant 0 : i32
    %c0_i32_1 = arith.constant 0 : i32
    return %c0_i32, %c0_i32_0 : i32, i32
  }
  func.func @transform_6(%arg0: i32) -> (i32, i32) {
    %c0_i32 = arith.constant 0 : i32
    %c0_i32_0 = arith.constant 0 : i32
    %c0_i32_1 = arith.constant 0 : i32
    return %c0_i32, %c0_i32_0 : i32, i32
  }
  func.func @transform_7(%arg0: i32) -> (i32, i32) {
    %c0_i32 = arith.constant 0 : i32
    %c0_i32_0 = arith.constant 0 : i32
    %c0_i32_1 = arith.constant 0 : i32
    return %c0_i32, %c0_i32_0 : i32, i32
  }
  func.func @transform_8(%arg0: i32) -> (i32, i32) {
    %c0_i32 = arith.constant 0 : i32
    %c0_i32_0 = arith.constant 0 : i32
    %c0_i32_1 = arith.constant 0 : i32
    return %c0_i32, %c0_i32_0 : i32, i32
  }
  func.func @transform_9(%arg0: i32) -> (i32, i32) {
    %c0_i32 = arith.constant 0 : i32
    %c0_i32_0 = arith.constant 0 : i32
    %c0_i32_1 = arith.constant 0 : i32
    return %c0_i32, %c0_i32_0 : i32, i32
  }
  func.func @transform_10(%arg0: i32) -> (i32, i32) {
    %c0_i32 = arith.constant 0 : i32
    %c0_i32_0 = arith.constant 0 : i32
    %c0_i32_1 = arith.constant 0 : i32
    return %c0_i32, %c0_i32_0 : i32, i32
  }
  func.func @transform_11(%arg0: i32) -> (i32, i32) {
    %c0_i32 = arith.constant 0 : i32
    %c0_i32_0 = arith.constant 0 : i32
    %c0_i32_1 = arith.constant 0 : i32
    return %c0_i32, %c0_i32_0 : i32, i32
  }
  func.func @transform_12(%arg0: i32) -> (i32, i32) {
    %c0_i32 = arith.constant 0 : i32
    %c0_i32_0 = arith.constant 0 : i32
    %c0_i32_1 = arith.constant 0 : i32
    return %c0_i32, %c0_i32_0 : i32, i32
  }
  func.func @transform_13(%arg0: i32) -> (i32, i32, i32) {
    %c0_i32 = arith.constant 0 : i32
    %c0_i32_0 = arith.constant 0 : i32
    %c0_i32_1 = arith.constant 0 : i32
    return %arg0, %c0_i32, %c0_i32_0 : i32, i32, i32
  }
}

module attributes {stable_mosaic.version = 11 : i64} {
  func.func @heads_kernel(%arg0: i32, %arg1: memref<1x8x32xf32, #tpu.memory_space<vmem>>, %arg2: memref<32x3xf32, #tpu.memory_space<vmem>>, %arg3: memref<1x3xf32, #tpu.memory_space<vmem>>, %arg4: memref<1x8x3xf32, #tpu.memory_space<vmem>>) attributes {dimension_semantics = [#tpu.dimension_semantics<parallel>], iteration_bounds = array<i64: 2>, scalar_prefetch = 0 : i64, scratch_operands = 0 : i64, tpu.core_type = #tpu.core_type<tc>, window_params = [{transform_indices = @transform_0, window_bounds = array<i64: 1, 8, 32>}, {pipeline_mode = #tpu.pipeline_mode<synchronous>, transform_indices = @transform_1, window_bounds = array<i64: 32, 3>}, {pipeline_mode = #tpu.pipeline_mode<synchronous>, transform_indices = @transform_2, window_bounds = array<i64: 1, 3>}, {transform_indices = @transform_3, window_bounds = array<i64: 1, 8, 3>}]} {
    %c0 = arith.constant 0 : index
    %c0_0 = arith.constant 0 : index
    %c0_1 = arith.constant 0 : index
    %0 = vector.load %arg1[%c0, %c0_0, %c0_1] : memref<1x8x32xf32, #tpu.memory_space<vmem>>, vector<1x8x32xf32>
    %1 = vector.shape_cast %0 : vector<1x8x32xf32> to vector<8x32xf32>
    %c0_2 = arith.constant 0 : index
    %c0_3 = arith.constant 0 : index
    %2 = vector.load %arg2[%c0_2, %c0_3] : memref<32x3xf32, #tpu.memory_space<vmem>>, vector<32x3xf32>
    %cst = arith.constant dense<0.000000e+00> : vector<8x3xf32>
    %3 = tpu.matmul %1, %2, %cst {dimension_numbers = #tpu.dot_dimension_numbers<[1], [0], [0], [1], [0, 0, 1, 1], [], []>} : vector<8x32xf32>, vector<32x3xf32>, vector<8x3xf32> -> vector<8x3xf32>
    %c0_4 = arith.constant 0 : index
    %c0_5 = arith.constant 0 : index
    %4 = vector.load %arg3[%c0_4, %c0_5] : memref<1x3xf32, #tpu.memory_space<vmem>>, vector<1x3xf32>
    %5 = vector.broadcast %4 : vector<1x3xf32> to vector<8x3xf32>
    %6 = arith.addf %3, %5 : vector<8x3xf32>
    %c0_6 = arith.constant 0 : index
    %c0_7 = arith.constant 0 : index
    %c0_8 = arith.constant 0 : index
    %7 = vector.load %arg4[%c0_6, %c0_7, %c0_8] : memref<1x8x3xf32, #tpu.memory_space<vmem>>, vector<1x8x3xf32>
    %8 = vector.shape_cast %7 : vector<1x8x3xf32> to vector<8x3xf32>
    %9 = vector.shape_cast %6 : vector<8x3xf32> to vector<1x8x3xf32>
    tpu.vector_store %arg4[%c0_6, %c0_7, %c0_8], %9 {strides = array<i32>} : memref<1x8x3xf32, #tpu.memory_space<vmem>>, vector<1x8x3xf32>,
    return
  }
  func.func @transform_0(%arg0: i32) -> (i32, i32, i32) {
    %c0_i32 = arith.constant 0 : i32
    %c0_i32_0 = arith.constant 0 : i32
    %c0_i32_1 = arith.constant 0 : i32
    return %arg0, %c0_i32, %c0_i32_0 : i32, i32, i32
  }
  func.func @transform_1(%arg0: i32) -> (i32, i32) {
    %c0_i32 = arith.constant 0 : i32
    %c0_i32_0 = arith.constant 0 : i32
    %c0_i32_1 = arith.constant 0 : i32
    return %c0_i32, %c0_i32_0 : i32, i32
  }
  func.func @transform_2(%arg0: i32) -> (i32, i32) {
    %c0_i32 = arith.constant 0 : i32
    %c0_i32_0 = arith.constant 0 : i32
    %c0_i32_1 = arith.constant 0 : i32
    return %c0_i32, %c0_i32_0 : i32, i32
  }
  func.func @transform_3(%arg0: i32) -> (i32, i32, i32) {
    %c0_i32 = arith.constant 0 : i32
    %c0_i32_0 = arith.constant 0 : i32
    %c0_i32_1 = arith.constant 0 : i32
    return %arg0, %c0_i32, %c0_i32_0 : i32, i32, i32
  }
}

</mosaic_0001>

<bundles_post_ra>
// kernel: vec_transformer_forward.4
= control target key start
LH: loop header
LB: loop body
LE: loop exit
PB: predicated region body
PF: predicated region fallthrough
CT: control target
= control target key end

     0   :  { %s405_s15 = smov 0   ;;  %s434_s0 = inlined_call_operand.vmem [shape: f32[2,8,16], index: 0, kind: input, shape index: {}]   ;;  %s435_s1 = inlined_call_operand.vmem [shape: f32[16,32], index: 1, kind: input, shape index: {}]   ;;  %s436_s2 = inlined_call_operand.vmem [shape: f32[1,32], index: 2, kind: input, shape index: {}]   ;;  %s437_s3 = inlined_call_operand.vmem [shape: f32[8,32], index: 3, kind: input, shape index: {}]   ;;  %s438_s4 = inlined_call_operand.vmem [shape: f32[2,8,32], index: 4, kind: output, shape index: {}]  }
   0x1 LB: > { %s334_s16 = sadd.s32 4294967295, %s375_s15   ;;  %p338_p0 = scmp.ge.s32.totalorder %s375_s15, 1  ;;  %s375_s15 = sphi %s405_s15, %s14_s15  }
   0x2   : > { %p161_p1 = scmp.lt.s32.totalorder %s375_s15, 3 }
   0x4   : > { %p162_p2 = pnand %p338_p0, %p161_p1 }
   0x5   : > { %v194_v0 = vld [vmem:[%s435_s1] sm:$0xff] (!%p162_p2)  ;;  %v195_v1 = vld [vmem:[%s435_s1 + $0x8] sm:$0xff] (!%p162_p2)  ;;  %p185_p3 = scmp.lt.s32.totalorder (!%p162_p2), %s334_s16, 1  ;;  %v377_v2 = vmov (!%p162_p2), 0.0|0.0   ;;  %vm378_vm0 = vmmov (!%p162_p2), 0   ;;  %v379_v4 = vmov (!%p162_p2), 0.0  }
   0x6   : > { %165 = sbr.rel (%p162_p2) target bundleno = 234 (0xea), region = 36  ;;  %355 = vmatprep.subr.bf16.mxu0 (!%p162_p2), %v377_v2  ;;  %v356_v3 = vpack.c.bf16 (!%p162_p2), %v195_v1, %v194_v0  ;;  %352 = vmatprep.mubr.msk.f32.mxu0 (!%p162_p2), %vm378_vm0, %v379_v4  ;;  %vm203_vm1 = vcmask (!%p162_p2), 130048   ;;  %v341_v6 = vld [vmem:[%s436_s2] ss:$0 sm:$0xff] (!%p162_p2)  ;;  %vm279_vm2 = vcmask (!%p162_p2), 261120  }
   0x7   : > { %v277_v8 = vld [vmem:[%s437_s3] sm:$0xff] (!%p162_p2) }
   0x8   : > { %357 = vmatpush3.bf16.msra.mxu0 (!%p162_p2), %v356_v3 }
   0xd   : > { %s440_s16 = smov (!%p185_p3, %s334_s16), 1 }
   0xe   : > { %s339_s21 = sshll.u32 %s440_s16, 3 }
   0xf   : > { %s188_s24 = scalar_lea.vmem %s434_s0, %s339_s21  ;;  %s192_s5 = scalar_lea.vmem %s438_s4, %s339_s21 }
  0x10   : > { %v193_v5 = vld [vmem:[%s188_s24] sm:$0xff] }
  0x11   : > { %353 = vmatmul.mubr.msk.f32.vlgmr.msra.gmra.mrb[0].mxu0 %vm203_vm1, %v193_v5 }
  0xe4   : > { %v273_v7 = vpop.f32.mrb[0].mxu0 }
  0xe5   : > { %v274_v9 = vadd.f32 %v341_v6, %v273_v7  ;;  %v354_v10 = vpop.f32.mrb[1].mxu0 }
  0xe7   : > { %v278_v11 = vadd.f32 %v277_v8, %v274_v9 }
  0xe9   : > { %280 = vst.msk [vmem:[%s192_s5] sm:$0xff] %vm279_vm2, %v278_v11 }
  0xea PF: > { %s14_s15 = sadd.s32 1, %s375_s15  }
  0xeb   : > { %p11_p4 = scmp.ge.s32.totalorder %s14_s15, 4  }
  0xed   :  { %13 = sbr.rel (!%p11_p4) target bundleno = 1 (0x1), region = 66 }

// kernel: vec_transformer_forward.7
= control target key start
LH: loop header
LB: loop body
LE: loop exit
PB: predicated region body
PF: predicated region fallthrough
CT: control target
= control target key end

     0   :  { %s382_s12 = smov 0   ;;  %s414_s0 = inlined_call_operand.vmem [shape: f32[2,8,32], index: 0, kind: input, shape index: {}]   ;;  %s415_s1 = inlined_call_operand.vmem [shape: f32[32,3], index: 1, kind: input, shape index: {}]   ;;  %s416_s2 = inlined_call_operand.vmem [shape: f32[1,3], index: 2, kind: input, shape index: {}]   ;;  %s417_s3 = inlined_call_operand.vmem [shape: f32[2,8,3], index: 3, kind: output, shape index: {}]  }
   0x1 LB: > { %s307_s13 = sadd.s32 4294967295, %s357_s12   ;;  %p311_p0 = scmp.ge.s32.totalorder %s357_s12, 1  ;;  %s357_s12 = sphi %s382_s12, %s13_s12  }
   0x2   : > { %p136_p1 = scmp.lt.s32.totalorder %s357_s12, 3 }
   0x4   : > { %p137_p2 = pnand %p311_p0, %p136_p1 }
   0x5   : > { %v167_v0 = vld [vmem:[%s415_s1] sm:$0xff] (!%p137_p2)  ;;  %v168_v1 = vld [vmem:[%s415_s1 + $0x8] sm:$0xff] (!%p137_p2)  ;;  %v169_v2 = vld [vmem:[%s415_s1 + $0x10] sm:$0xff] (!%p137_p2)  ;;  %v359_v3 = vmov (!%p137_p2), 0.0|0.0   ;;  %vm360_vm0 = vmmov (!%p137_p2), 0   ;;  %v361_v6 = vmov (!%p137_p2), 0.0  }
   0x6   : > { %140 = sbr.rel (%p137_p2) target bundleno = 232 (0xe8), region = 32  ;;  %334 = vmatprep.subr.bf16.mxu0 (!%p137_p2), %v359_v3  ;;  %v335_v4 = vpack.c.bf16 (!%p137_p2), %v168_v1, %v167_v0  ;;  %v170_v5 = vld [vmem:[%s415_s1 + $0x18] sm:$0xff] (!%p137_p2)  ;;  %331 = vmatprep.mubr.msk.f32.mxu0 (!%p137_p2), %vm360_vm0, %v361_v6  ;;  %p158_p3 = scmp.lt.s32.totalorder (!%p137_p2), %s307_s13, 1  ;;  %vm178_vm1 = vcmask (!%p137_p2), 261120   ;;  %v314_v9 = vld [vmem:[%s416_s2] ss:$0 sm:$0xff] (!%p137_p2) }
   0x7   : > { %v338_v7 = vpack.c.bf16 (!%p137_p2), %v170_v5, %v169_v2  ;;  %vm252_vm2 = vcmask (!%p137_p2), 23552  }
   0x8   : > { %336 = vmatpush3.bf16.msra.mxu0 (!%p137_p2), %v335_v4 }
   0x9   : > { %337 = vmatprep.subr.bf16.mxu0 (!%p137_p2), %v359_v3 }
   0xc   : > { %339 = vmatpush3.bf16.msra.mxu0 (!%p137_p2), %v338_v7 }
   0xd   : > { %s419_s13 = smov (!%p158_p3, %s307_s13), 1 }
   0xe   : > { %s312_s22 = sshll.u32 %s419_s13, 3 }
   0xf   : > { %s161_s25 = scalar_lea.vmem %s414_s0, %s312_s22  ;;  %s165_s30 = scalar_lea.vmem %s417_s3, %s312_s22 }
  0x10   : > { %v166_v8 = vld [vmem:[%s161_s25] sm:$0xff] }
  0x11   : > { %332 = vmatmul.mubr.msk.f32.vlgmr.msra.gmra.mrb[0].mxu0 %vm178_vm1, %v166_v8 }
  0xe4   : > { %v248_v10 = vpop.f32.mrb[0].mxu0 }
  0xe5   : > { %v249_v11 = vadd.f32 %v314_v9, %v248_v10  ;;  %v333_v12 = vpop.f32.mrb[1].mxu0 }
  0xe7   : > { %253 = vst.msk [vmem:[%s165_s30] sm:$0xff] %vm252_vm2, %v249_v11 }
  0xe8 PF: > { %s13_s12 = sadd.s32 1, %s357_s12  }
  0xe9   : > { %p10_p4 = scmp.ge.s32.totalorder %s13_s12, 4  }
  0xeb   :  { %12 = sbr.rel (!%p10_p4) target bundleno = 1 (0x1), region = 62 }

// kernel: vec_transformer_forward.5
= control target key start
LH: loop header
LB: loop body
LE: loop exit
PB: predicated region body
PF: predicated region fallthrough
CT: control target
= control target key end

     0   :  { %s2117_s25 = smov 0   ;;  %s2327_s0 = inlined_call_operand.vmem [shape: f32[2,8,32], index: 0, kind: input, shape index: {}]   ;;  %s2328_s1 = inlined_call_operand.vmem [shape: f32[32,96], index: 1, kind: input, shape index: {}]   ;;  %s2329_s2 = inlined_call_operand.vmem [shape: f32[1,96], index: 2, kind: input, shape index: {}]   ;;  %s2330_s3 = inlined_call_operand.vmem [shape: f32[32,32], index: 3, kind: input, shape index: {}]   ;;  %s2331_s4 = inlined_call_operand.vmem [shape: f32[1,32], index: 4, kind: input, shape index: {}]   ;;  %s2332_s5 = inlined_call_operand.vmem [shape: f32[1,32], index: 5, kind: input, shape index: {}]   ;;  %s2333_s6 = inlined_call_operand.vmem [shape: f32[1,32], index: 6, kind: input, shape index: {}]   ;;  %s2334_s7 = inlined_call_operand.vmem [shape: f32[32,64], index: 7, kind: input, shape index: {}]   ;;  %s2335_s8 = inlined_call_operand.vmem [shape: f32[1,64], index: 8, kind: input, shape index: {}]   ;;  %s2336_s9 = inlined_call_operand.vmem [shape: f32[64,32], index: 9, kind: input, shape index: {}]   ;;  %s2337_s10 = inlined_call_operand.vmem [shape: f32[1,32], index: 10, kind: input, shape index: {}]   ;;  %s2338_s11 = inlined_call_operand.vmem [shape: f32[1,32], index: 11, kind: input, shape index: {}]   ;;  %s2339_s12 = inlined_call_operand.vmem [shape: f32[1,32], index: 12, kind: input, shape index: {}]   ;;  %s2340_s13 = inlined_call_operand.vmem [shape: f32[2,8,32], index: 13, kind: output, shape index: {}]  }
   0x1 LB: > { %s1779_s26 = sadd.s32 4294967295, %s2031_s25   ;;  %p1783_p0 = scmp.ge.s32.totalorder %s2031_s25, 1  ;;  %s2031_s25 = sphi %s2117_s25, %s23_s25  }
   0x2   : > { %p386_p1 = scmp.lt.s32.totalorder %s2031_s25, 3 }
   0x4   : > { %p387_p2 = pnand %p1783_p0, %p386_p1 }
   0x5   : > { %v437_v0 = vld [vmem:[%s2328_s1] sm:$0xff] (!%p387_p2)  ;;  %v438_v1 = vld [vmem:[%s2328_s1 + $0x8] sm:$0xff] (!%p387_p2)  ;;  %v439_v2 = vld [vmem:[%s2328_s1 + $0x10] sm:$0xff] (!%p387_p2)  ;;  %v2033_v3 = vmov (!%p387_p2), 0.0|0.0   ;;  %vm2034_vm0 = vmmov (!%p387_p2), 0   ;;  %v2035_v6 = vmov (!%p387_p2), 0.0  }
   0x6   : > { %390 = sbr.rel (%p387_p2) target bundleno = 3640 (0xe38), region = 72  ;;  %1959 = vmatprep.subr.bf16.mxu0 (!%p387_p2), %v2033_v3  ;;  %v1960_v4 = vpack.c.bf16 (!%p387_p2), %v438_v1, %v437_v0  ;;  %v440_v5 = vld [vmem:[%s2328_s1 + $0x18] sm:$0xff] (!%p387_p2)  ;;  %1866 = vmatprep.mubr.msk.f32.mxu0 (!%p387_p2), %vm2034_vm0, %v2035_v6  ;;  %p428_p3 = scmp.lt.s32.totalorder (!%p387_p2), %s1779_s26, 1  ;;  %vm448_vm1 = vcmask (!%p387_p2), 261120   ;;  %v1786_v9 = vld [vmem:[%s2329_s2] ss:$0 sm:$0xff] (!%p387_p2) }
   0x7   : > { %1874 = vmatprep.subr.mxu1 (!%p387_p2), %v2035_v6  ;;  %1876 = vmatprep.mubr.msk.f32.mxu1 (!%p387_p2), %vm2034_vm0, %v2035_v6  ;;  %v1963_v7 = vpack.c.bf16 (!%p387_p2), %v440_v5, %v439_v2  ;;  %s2036_s24 = smov (!%p387_p2), 96   ;;  %s2037_s27 = smov (!%p387_p2), 120   ;;  %vm526_vm2 = vcmask (!%p387_p2), 64512   ;;  %v855_v33 = vld [vmem:[%s2330_s3 + $0x8] sm:$0xff] (!%p387_p2)  ;;  %v689_v42 = vld [vmem:[%s2330_s3] sm:$0xff] (!%p387_p2)  ;;  %v1167_v5 = vld [vmem:[%s2330_s3 + $0x10] sm:$0xff] (!%p387_p2) }
   0x8   : > { %1961 = vmatpush3.bf16.msra.mxu0 (!%p387_p2), %v1960_v4  ;;  %s2038_s28 = smov (!%p387_p2), 88   ;;  %s2039_s29 = smov (!%p387_p2), 56   ;;  %vm1621_vm3 = vcmask (!%p387_p2), 523264  }
   0x9   : > { %1962 = vmatprep.subr.bf16.mxu0 (!%p387_p2), %v2033_v3  ;;  %s2040_s30 = smov (!%p387_p2), 64   ;;  %s2041_s14 = smov (!%p387_p2), 80  }
   0xa   : > { %s2042_s15 = smov (!%p387_p2), 112   ;;  %s2044_s22 = smov (!%p387_p2), 104  }
   0xb   : > { %s2045_s23 = smov (!%p387_p2), 48  }
   0xc   : > { %1964 = vmatpush3.bf16.msra.mxu0 (!%p387_p2), %v1963_v7 }
   0xd   : > { %s2342_s26 = smov (!%p428_p3, %s1779_s26), 1  ;;  %1869 = vmatprep.subr.mxu0 %v2035_v6 }
   0xe   : > { %s1784_s18 = sshll.u32 %s2342_s26, 3 }
   0xf   : > { %s431_s21 = scalar_lea.vmem %s2327_s0, %s1784_s18 }
  0x10   : > { %v2152_v8 = vld [vmem:[%s431_s21] sm:$0xff]  ;;  %s2043_s21 = smov 72  }
  0x11   : > { %1867 = vmatmul.mubr.msk.f32.vlgmr.msra.gmra.mrb[0].mxu0 %vm448_vm1, %v2152_v8 }
  0x12   : > { %1871 = vmatprep.mubr.msk.f32.mxu0 %vm2034_vm0, %v2035_v6 }
  0xe4   : > { %v518_v10 = vpop.f32.mrb[0].mxu0 }
  0xe5   : > { %v2162_v11 = vadd.f32 %v1786_v9, %v518_v10  ;;  %v1868_v12 = vpop.f32.mrb[1].mxu0 }
  0xe7   : > { %524 = vrot.lane.b32.xlu0 %v2162_v11, %s2036_s24  ;;  %v2166_v13 = vmul.f32 0.35355338, %v2162_v11 }
  0xe9   : > { %690 = vrot.lane.b32.xlu1 %v2166_v13, %s2037_s27 }
  0xeb   : > { %692 = vrot.lane.b32.xlu0 %v2162_v11, %s2038_s28  ;;  %s2046_s28 = smov 40  }
 0x159   : > { %v525_v14 = vpop.permute.xlu0 %524 }
 0x15a   : > { %1870 = vmatpush3.xpose.msk.msra.mxu0 %vm526_vm2, %v525_v14 }
 0x15b   : > { %1879 = vmatprep.subr.mxu0 %v2035_v6  ;;  %v691_v16 = vpop.permute.xlu1 %690 }
 0x15d   : > { %v693_v15 = vpop.permute.xlu0 %692  ;;  %1872 = vmatmul.mubr.msk.f32.vlgmr.msra.gmra.mrb[2].mxu0 %vm526_vm2, %v2166_v13 }
 0x15e   : > { %1880 = vmatpush3.xpose.msk.msra.mxu0 %vm526_vm2, %v693_v15  ;;  %1881 = vmatprep.mubr.msk.f32.mxu0 %vm2034_vm0, %v2035_v6 }
 0x15f   : > { %1889 = vmatprep.subr.mxu0 %v2035_v6 }
 0x161   : > { %1882 = vmatmul.mubr.msk.f32.vlgmr.msra.gmra.mrb[4].mxu0 %vm526_vm2, %v691_v16 }
 0x162   : > { %1891 = vmatprep.mubr.msk.f32.mxu0 %vm2034_vm0, %v2035_v6  ;;  %1890 = vmatpush3.msra.mxu0 %v855_v33 }
 0x163   : > { %1899 = vmatprep.subr.mxu0 %v2035_v6 }
 0x230   : > { %v598_v17 = vpop.f32.mrb[2].mxu0 }
 0x231   : > { %v1873_v18 = vpop.f32.mrb[3].mxu0  ;;  %v602_v19 = vsel %vm526_vm2, %v598_v17, -inf }
 0x232   : > { %603 = vmax.xlane.f32.xlu1 %v602_v19 }
 0x234   : > { %v764_v20 = vpop.f32.mrb[4].mxu0 }
 0x235   : > { %v1883_v21 = vpop.f32.mrb[5].mxu0  ;;  %v768_v22 = vsel %vm526_vm2, %v764_v20, -inf }
 0x236   : > { %769 = vmax.xlane.f32.xlu0 %v768_v22 }
 0x2bf   : > { %v604_v23 = vpop.xlane.xlu1 %603 }
 0x2c0   : > { %v605_v24 = vsub.f32 %v598_v17, %v604_v23 }
 0x2c2   : > { %v606_v25 = vmul.f32 1.442695, %v605_v24 }
 0x2c3   : > { %v770_v26 = vpop.xlane.xlu0 %769 }
 0x2c4   : > { %2005 = vpow2.f32 %v606_v25  ;;  %v771_v27 = vsub.f32 %v764_v20, %v770_v26  ;;  %v1407_v20 = vld [vmem:[%s2330_s3 + $0x18] sm:$0xff] }
 0x2c6   : > { %v772_v28 = vmul.f32 1.442695, %v771_v27 }
 0x2c8   : > { %2007 = vpow2.f32 %v772_v28 }
 0x2ce   : > { %v2006_v29 = vpop.eup %2005 }
 0x2cf   : > { %v608_v30 = vsel %vm526_vm2, %v2006_v29, 0.0 }
 0x2d0   : > { %609 = vadd.xlane.f32.xlu0 %v608_v30 }
 0x2d2   : > { %v2008_v31 = vpop.eup %2007 }
 0x2d3   : > { %v774_v32 = vsel %vm526_vm2, %v2008_v31, 0.0 }
 0x2d4   : > { %775 = vadd.xlane.f32.xlu1 %v774_v32 }
 0x2e5   : > { %779 = vrot.lane.b32.xlu1 %v2162_v11, %s2039_s29  ;;  %s435_s29 = scalar_lea.vmem %s2340_s13, %s1784_s18 }
 0x2e6   : > { %613 = vrot.lane.b32.xlu0 %v2162_v11, %s2040_s30 }
 0x2e9   : > { %1004 = vrot.lane.b32.xlu1 %v2162_v11, %s2041_s14 }
 0x2ea   : > { %1002 = vrot.lane.b32.xlu0 %v2166_v13, %s2042_s15 }
 0x35d   : > { %v610_v34 = vpop.xlane.xlu0 %609 }
 0x35e   : > { %2009 = vrcp.f32 %v610_v34 }
 0x361   : > { %v776_v35 = vpop.xlane.xlu1 %775  ;;  %v614_v36 = vpop.permute.xlu0 %613 }
 0x362   : > { %2011 = vrcp.f32 %v776_v35  ;;  %1875 = vmatpush3.msra.mxu1 %v614_v36 }
 0x363   : > { %1884 = vmatprep.subr.mxu1 %v2035_v6 }
 0x365   : > { %v780_v39 = vpop.permute.xlu1 %779  ;;  %v1003_v48 = vpop.permute.xlu0 %1002 }
 0x368   : > { %v2010_v37 = vpop.eup %2009 }
 0x369   : > { %v612_v38 = vmul.f32 %v2010_v37, %v2006_v29  ;;  %v1005_v46 = vpop.permute.xlu1 %1004  ;;  %v1804_v29 = vld [vmem:[%s2331_s4] ss:$0 sm:$0xff] }
 0x36b   : > { %1877 = vmatmul.mubr.msk.f32.vlgmr.msra.gmra.mrb[0].mxu1 %vm526_vm2, %v612_v38 }
 0x36c   : > { %v2012_v40 = vpop.eup %2011  ;;  %1885 = vmatpush3.msra.mxu1 %v780_v39  ;;  %1886 = vmatprep.mubr.msk.f32.mxu1 %vm2034_vm0, %v2035_v6 }
 0x36d   : > { %v778_v41 = vmul.f32 %v2012_v40, %v2008_v31  ;;  %1894 = vmatprep.subr.mxu1 %v2035_v6  ;;  %v1522_v40 = vld [vmem:[%s2334_s7 + $0x8] sm:$0xff] }
 0x36f   : > { %1887 = vmatmul.mubr.msk.f32.vlgmr.msra.gmra.mrb[2].mxu1 %vm526_vm2, %v778_v41 }
 0x370   : > { %1896 = vmatprep.mubr.msk.f32.mxu1 %vm2034_vm0, %v2035_v6  ;;  %1895 = vmatpush3.msra.mxu1 %v689_v42  ;;  %v1524_v42 = vld [vmem:[%s2334_s7 + $0x18] sm:$0xff] }
 0x371   : > { %1904 = vmatprep.subr.mxu1 %v2035_v6 }
 0x43e   : > { %v685_v43 = vpop.f32.mrb[0].mxu1 }
 0x43f   : > { %v1878_v44 = vpop.f32.mrb[1].mxu1  ;;  %1897 = vmatmul.mubr.msk.f32.vlgmr.msra.gmra.mrb[4].mxu1 %vm526_vm2, %v685_v43 }
 0x440   : > { %1906 = vmatprep.mubr.msk.f32.mxu1 %vm2034_vm0, %v2035_v6  ;;  %v1606_v44 = vld [vmem:[%s2336_s9] sm:$0xff] }
 0x442   : > { %v851_v45 = vpop.f32.mrb[2].mxu1 }
 0x443   : > { %v1888_v47 = vpop.f32.mrb[3].mxu1  ;;  %1892 = vmatmul.mubr.msk.f32.vlgmr.msra.gmra.mrb[6].mxu0 %vm526_vm2, %v851_v45  ;;  %v1607_v45 = vld [vmem:[%s2336_s9 + $0x8] sm:$0xff] }
 0x444   : > { %1900 = vmatpush3.xpose.msk.msra.mxu0 %vm526_vm2, %v1005_v46  ;;  %1901 = vmatprep.mubr.msk.f32.mxu0 %vm2034_vm0, %v2035_v6  ;;  %v1608_v46 = vld [vmem:[%s2336_s9 + $0x10] sm:$0xff]  ;;  %v1972_v47 = vpack.c.bf16 %v1607_v45, %v1606_v44 }
 0x445   : > { %1909 = vmatprep.subr.mxu0 %v2035_v6 }
 0x447   : > { %1902 = vmatmul.mubr.msk.f32.vlgmr.msra.gmra.mrb[8].mxu0 %vm526_vm2, %v1003_v48  ;;  %v1609_v48 = vld [vmem:[%s2336_s9 + $0x18] sm:$0xff] }
 0x448   : > { %1911 = vmatprep.mubr.msk.f32.mxu0 %vm2034_vm0, %v2035_v6  ;;  %1910 = vmatpush3.msra.mxu0 %v1167_v5 }
 0x449   : > { %1919 = vmatprep.subr.mxu0 %v2035_v6 }
 0x512   : > { %v998_v49 = vpop.f32.mrb[4].mxu1 }
 0x513   : > { %v1898_v50 = vpop.f32.mrb[5].mxu1 }
 0x514   : > { %v1610_v50 = vld [vmem:[%s2336_s9 + $0x20] sm:$0xff] }
 0x516   : > { %v925_v51 = vpop.f32.mrb[6].mxu0 }
 0x517   : > { %v999_v52 = vadd.f32 %v998_v49, %v925_v51  ;;  %v1893_v53 = vpop.f32.mrb[7].mxu0  ;;  %v1975_v49 = vpack.c.bf16 %v1609_v48, %v1608_v46  ;;  %v1611_v51 = vld [vmem:[%s2336_s9 + $0x28] sm:$0xff] }
 0x51a   : > { %v1076_v54 = vpop.f32.mrb[8].mxu0 }
 0x51b   : > { %v1903_v55 = vpop.f32.mrb[9].mxu0  ;;  %v1080_v56 = vsel %vm526_vm2, %v1076_v54, -inf }
 0x51c   : > { %1081 = vmax.xlane.f32.xlu1 %v1080_v56 }
 0x52d   : > { %1244 = vrot.lane.b32.xlu1 %v2162_v11, %s2043_s21 }
 0x531   : > { %1242 = vrot.lane.b32.xlu1 %v2166_v13, %s2044_s22 }
 0x5a9   : > { %v1082_v57 = vpop.xlane.xlu1 %1081 }
 0x5aa   : > { %v1083_v58 = vsub.f32 %v1076_v54, %v1082_v57  ;;  %v1805_v57 = vld [vmem:[%s2332_s5] ss:$0 sm:$0xff] }
 0x5ac   : > { %v1084_v59 = vmul.f32 1.442695, %v1083_v58 }
 0x5ad   : > { %v1245_v1 = vpop.permute.xlu1 %1244 }
 0x5ae   : > { %2013 = vpow2.f32 %v1084_v59  ;;  %v1806_v59 = vld [vmem:[%s2333_s6] ss:$0 sm:$0xff] }
 0x5b1   : > { %v1243_v4 = vpop.permute.xlu1 %1242 }
 0x5b8   : > { %v2014_v60 = vpop.eup %2013 }
 0x5b9   : > { %v1086_v61 = vsel %vm526_vm2, %v2014_v60, 0.0 }
 0x5ba   : > { %1087 = vadd.xlane.f32.xlu0 %v1086_v61 }
 0x5d0   : > { %1091 = vrot.lane.b32.xlu0 %v2162_v11, %s2045_s23 }
 0x647   : > { %v1088_v62 = vpop.xlane.xlu0 %1087 }
 0x648   : > { %2015 = vrcp.f32 %v1088_v62  ;;  %v1613_v62 = vld [vmem:[%s2336_s9 + $0x38] sm:$0xff] }
 0x64b   : > { %v1092_v63 = vpop.permute.xlu0 %1091 }
 0x64c   : > { %1905 = vmatpush3.msra.mxu1 %v1092_v63 }
 0x64d   : > { %1914 = vmatprep.subr.mxu1 %v2035_v6 }
 0x652   : > { %v2016_v0 = vpop.eup %2015 }
 0x653   : > { %v1090_v2 = vmul.f32 %v2016_v0, %v2014_v60  ;;  %v1807_v0 = vld [vmem:[%s2335_s8] ss:$0 sm:$0xff] }
 0x655   : > { %1907 = vmatmul.mubr.msk.f32.vlgmr.msra.gmra.mrb[6].mxu1 %vm526_vm2, %v1090_v2 }
 0x656   : > { %1915 = vmatpush3.xpose.msk.msra.mxu1 %vm526_vm2, %v1245_v1  ;;  %1916 = vmatprep.mubr.msk.f32.mxu1 %vm2034_vm0, %v2035_v6 }
 0x657   : > { %1924 = vmatprep.subr.mxu1 %v2035_v6 }
 0x659   : > { %1917 = vmatmul.mubr.msk.f32.vlgmr.msra.gmra.mrb[8].mxu1 %vm526_vm2, %v1243_v4 }
 0x65a   : > { %1926 = vmatprep.mubr.msk.f32.mxu1 %vm2034_vm0, %v2035_v6  ;;  %1925 = vmatpush3.msra.mxu1 %v1407_v20 }
 0x65b   : > { %1971 = vmatprep.subr.bf16.mxu1 %v2033_v3 }
 0x728   : > { %v1163_v7 = vpop.f32.mrb[6].mxu1 }
 0x729   : > { %v1908_v9 = vpop.f32.mrb[7].mxu1  ;;  %1912 = vmatmul.mubr.msk.f32.vlgmr.msra.gmra.mrb[10].mxu0 %vm526_vm2, %v1163_v7  ;;  %v1809_v7 = vld [vmem:[%s2337_s10] ss:$0 sm:$0xff] }
 0x72a   : > { %1921 = vmatprep.mubr.msk.f32.mxu0 %vm2034_vm0, %v2035_v6 }
 0x72c   : > { %v1316_v10 = vpop.f32.mrb[8].mxu1 }
 0x72d   : > { %v1918_v12 = vpop.f32.mrb[9].mxu1  ;;  %v1320_v13 = vsel %vm526_vm2, %v1316_v10, -inf }
 0x72e   : > { %1321 = vmax.xlane.f32.xlu0 %v1320_v13 }
 0x744   : > { %1331 = vrot.lane.b32.xlu0 %v2162_v11, %s2046_s28 }
 0x7bb   : > { %v1322_v14 = vpop.xlane.xlu0 %1321 }
 0x7bc   : > { %v1323_v15 = vsub.f32 %v1316_v10, %v1322_v14 }
 0x7be   : > { %v1324_v16 = vmul.f32 1.442695, %v1323_v15 }
 0x7bf   : > { %v1332_v17 = vpop.permute.xlu0 %1331 }
 0x7c0   : > { %2017 = vpow2.f32 %v1324_v16  ;;  %1920 = vmatpush3.msra.mxu0 %v1332_v17 }
 0x7c1   : > { %1965 = vmatprep.subr.bf16.mxu0 %v2033_v3 }
 0x7ca   : > { %v2018_v18 = vpop.eup %2017 }
 0x7cb   : > { %v1326_v19 = vsel %vm526_vm2, %v2018_v18, 0.0 }
 0x7cc   : > { %1327 = vadd.xlane.f32.xlu1 %v1326_v19 }
 0x7fc   : > { %v1237_v11 = vpop.f32.mrb[10].mxu0 }
 0x7fd   : > { %v1241_v21 = vadd.f32 %v1237_v11, %v999_v52  ;;  %v1913_v22 = vpop.f32.mrb[11].mxu0  ;;  %v1978_v52 = vpack.c.bf16 %v1611_v51, %v1610_v50 }
 0x859   : > { %v1328_v23 = vpop.xlane.xlu1 %1327 }
 0x85a   : > { %2019 = vrcp.f32 %v1328_v23  ;;  %v1811_v23 = vld [vmem:[%s2338_s11] ss:$0 sm:$0xff] }
 0x864   : > { %v2020_v24 = vpop.eup %2019 }
 0x865   : > { %v1330_v25 = vmul.f32 %v2020_v24, %v2018_v18 }
 0x867   : > { %1922 = vmatmul.mubr.msk.f32.vlgmr.msra.gmra.mrb[12].mxu0 %vm526_vm2, %v1330_v25  ;;  %v1812_v25 = vld [vmem:[%s2339_s12] ss:$0 sm:$0xff] }
 0x868   : > { %1937 = vmatprep.mubr.msk.f32.mxu0 %vm2034_vm0, %v2035_v6 }
 0x93a   : > { %v1403_v26 = vpop.f32.mrb[12].mxu0 }
 0x93b   : > { %v1923_v27 = vpop.f32.mrb[13].mxu0  ;;  %1927 = vmatmul.mubr.msk.f32.vlgmr.msra.gmra.mrb[10].mxu1 %vm526_vm2, %v1403_v26 }
 0x93c   : > { %1956 = vmatprep.mubr.msk.f32.mxu1 %vm2034_vm0, %v2035_v6  ;;  %v1521_v6 = vld [vmem:[%s2334_s7] sm:$0xff]  ;;  %1973 = vmatpush3.bf16.msra.mxu1 %v1972_v47 }
 0x93d   : > { %v1966_v41 = vpack.c.bf16 %v1522_v40, %v1521_v6  ;;  %1974 = vmatprep.subr.bf16.mxu1 %v2033_v3 }
 0x93f   : > { %1967 = vmatpush3.bf16.msra.mxu0 %v1966_v41 }
 0x940   : > { %1968 = vmatprep.subr.bf16.mxu0 %v2033_v3  ;;  %1976 = vmatpush3.bf16.msra.mxu1 %v1975_v49 }
 0x941   : > { %1977 = vmatprep.subr.bf16.mxu1 %v2033_v3 }
 0x944   : > { %1979 = vmatpush3.bf16.msra.mxu1 %v1978_v52 }
 0x945   : > { %1980 = vmatprep.subr.bf16.mxu1 %v2033_v3  ;;  %v1612_v3 = vld [vmem:[%s2336_s9 + $0x30] sm:$0xff] }
 0x946   : > { %v1981_v63 = vpack.c.bf16 %v1613_v62, %v1612_v3 }
 0x948   : > { %1982 = vmatpush3.bf16.msra.mxu1 %v1981_v63 }
 0xa0e   : > { %v1477_v28 = vpop.f32.mrb[10].mxu1 }
 0xa0f   : > { %v1481_v30 = vadd.f32 %v1477_v28, %v1241_v21  ;;  %v1928_v31 = vpop.f32.mrb[11].mxu1 }
 0xa11   : > { %v1489_v32 = vadd.f32 %v1804_v29, %v1481_v30 }
 0xa13   : > { %v1490_v33 = vadd.f32 %v1489_v32, %v2152_v8  ;;  %v1523_v8 = vld [vmem:[%s2334_s7 + $0x10] sm:$0xff] }
 0xa14   : > { %v1969_v43 = vpack.c.bf16 %v1524_v42, %v1523_v8 }
 0xa15   : > { %v1493_v34 = vsel %vm448_vm1, %v1490_v33, 0.0 }
 0xa16   : > { %1494 = vadd.xlane.f32.xlu1 %v1493_v34  ;;  %1970 = vmatpush3.bf16.msra.mxu0 %v1969_v43 }
 0xaa3   : > { %v1495_v35 = vpop.xlane.xlu1 %1494 }
 0xaa4   : > { %v1497_v36 = vmul.f32 0.03125, %v1495_v35 }
 0xaa6   : > { %v1498_v37 = vsub.f32 %v1490_v33, %v1497_v36 }
 0xaa8   : > { %v1499_v38 = vmul.f32 %v1498_v37, %v1498_v37 }
 0xaaa   : > { %v1500_v39 = vsel %vm448_vm1, %v1499_v38, 0.0 }
 0xaab   : > { %1501 = vadd.xlane.f32.xlu1 %v1500_v39 }
 0xb38   : > { %v1502_v53 = vpop.xlane.xlu1 %1501 }
 0xb39   : > { %v1503_v54 = vmul.f32 0.03125, %v1502_v53 }
 0xb3b   : > { %v1504_v55 = vadd.f32 1e-05, %v1503_v54 }
 0xb3d   : > { %2021 = vrsqrt.f32 %v1504_v55 }
 0xb47   : > { %v2022_v56 = vpop.eup %2021 }
 0xb48   : > { %v1506_v58 = vmul.f32 %v2022_v56, %v1498_v37 }
 0xb4a   : > { %v1513_v60 = vmul.f32 %v1805_v57, %v1506_v58 }
 0xb4c   : > { %v1520_v61 = vadd.f32 %v1806_v59, %v1513_v60 }
 0xb4e   : > { %1938 = vmatmul.mubr.msk.f32.vlgmr.msra.gmra.mrb[14].mxu0 %vm448_vm1, %v1520_v61 }
 0xc21   : > { %v1601_v1 = vpop.f32.mrb[14].mxu0 }
 0xc22   : > { %v1602_v2 = vadd.f32 %v1807_v0, %v1601_v1  ;;  %v1939_v4 = vpop.f32.mrb[15].mxu0 }
 0xc24   : > { %v1605_v5 = vmax.f32 %v1602_v2, 0.0 }
 0xc26   : > { %1957 = vmatmul.mubr.msk.f32.vlgmr.msra.gmra.mrb[12].mxu1 %vm1621_vm3, %v1605_v5 }
 0xcf9   : > { %v1691_v9 = vpop.f32.mrb[12].mxu1 }
 0xcfa   : > { %v1692_v10 = vadd.f32 %v1809_v7, %v1691_v9  ;;  %v1958_v12 = vpop.f32.mrb[13].mxu1 }
 0xcfc   : > { %v1695_v13 = vadd.f32 %v1692_v10, %v1520_v61 }
 0xcfe   : > { %v1698_v14 = vsel %vm448_vm1, %v1695_v13, 0.0 }
 0xcff   : > { %1699 = vadd.xlane.f32.xlu1 %v1698_v14 }
 0xd8c   : > { %v1700_v15 = vpop.xlane.xlu1 %1699 }
 0xd8d   : > { %v1701_v16 = vmul.f32 0.03125, %v1700_v15 }
 0xd8f   : > { %v1702_v17 = vsub.f32 %v1695_v13, %v1701_v16 }
 0xd91   : > { %v1703_v18 = vmul.f32 %v1702_v17, %v1702_v17 }
 0xd93   : > { %v1704_v19 = vsel %vm448_vm1, %v1703_v18, 0.0 }
 0xd94   : > { %1705 = vadd.xlane.f32.xlu1 %v1704_v19 }
 0xe21   : > { %v1706_v20 = vpop.xlane.xlu1 %1705 }
 0xe22   : > { %v1707_v11 = vmul.f32 0.03125, %v1706_v20 }
 0xe24   : > { %v1708_v21 = vadd.f32 1e-05, %v1707_v11 }
 0xe26   : > { %2023 = vrsqrt.f32 %v1708_v21 }
 0xe30   : > { %v2024_v22 = vpop.eup %2023 }
 0xe31   : > { %v1710_v24 = vmul.f32 %v2024_v22, %v1702_v17 }
 0xe33   : > { %v1717_v26 = vmul.f32 %v1811_v23, %v1710_v24 }
 0xe35   : > { %v1724_v27 = vadd.f32 %v1812_v25, %v1717_v26 }
 0xe37   : > { %1725 = vst.msk [vmem:[%s435_s29] sm:$0xff] %vm448_vm1, %v1724_v27 }
 0xe38 PF: > { %s23_s25 = sadd.s32 1, %s2031_s25  }
 0xe39   : > { %p20_p4 = scmp.ge.s32.totalorder %s23_s25, 4  }
 0xe3b   :  { %22 = sbr.rel (!%p20_p4) target bundleno = 1 (0x1), region = 102 }

</bundles_post_ra>
